<compile_context>
chip_gen: v7x
topology: tpu7x:2x2x1
jax: 0.10.0
libtpu: 0.0.40
codegen_flags: <defaults>
</compile_context>

<pallas_src>
import jax
import jax.numpy as jnp
from jax.experimental import pallas as pl
from jax.experimental.pallas import tpu as pltpu


def _round_up(x, m):
    return (x + m - 1) // m * m


def _pick_tile(n_p, candidates, want_two_tiles=False):
    """Largest candidate that divides n_p (n_p is a multiple of 128)."""
    divs = [c for c in candidates if n_p % c == 0]
    if want_two_tiles:
        two = [c for c in divs if n_p // c >= 2]
        if two:
            return max(two)
    return max(divs)


def _cheby_gcn_kernel(sup_ref, adj_ref, b_ref, o_ref):
    d = pl.program_id(1)
    k = pl.program_id(2)

    # First reduction step for this row tile: seed the resident f32 output
    # block with the broadcast bias.  Accumulating directly into o_ref saves
    # a VMEM accumulator and a (tm, out_f_p) VPU epilogue pass per row tile.
    @pl.when(jnp.logical_and(d == 0, k == 0))
    def _init():
        o_ref[...] = jnp.zeros_like(o_ref) + b_ref[...]

    # out += adj[d, i_tile, k_tile] @ support[d, k_tile]   (bf16 MXU, f32 acc)
    o_ref[...] += jnp.dot(adj_ref[...], sup_ref[...],
                          preferred_element_type=jnp.float32)


def prepare_adj(adj, *, compute_dtype=jnp.bfloat16):
    """Cast / zero-pad the (static per graph) adjacency stack ONCE.

    adj: [D, N, N] -> [D, N_p, N_p] in compute_dtype, N_p = round_up(N, 128).
    Cache the result and pass it to cheby_graph_convolution so the forward
    pass does not pay an extra O(D*N^2) HBM cast/pad pass on every call.
    """
    _, n, _ = adj.shape
    n_p = _round_up(n, 128)
    a = adj.astype(compute_dtype)
    if n_p != n:
        a = jnp.pad(a, ((0, 0), (0, n_p - n), (0, n_p - n)))
    return a


def cheby_graph_convolution(x, adj, weight, bias=None, *,
                            compute_dtype=jnp.bfloat16):
    """Chebyshev graph convolution forward.

    x:      [N, in_f]
    adj:    [D, N, N]  (or an already-prepared [D, N_p, N_p] compute_dtype stack)
    weight: [D, in_f, out_f]
    bias:   [out_f] or None
    Returns float32 [N, out_f]  (bf16 MXU inputs, f32 accumulation).
    """
    n, in_f = x.shape
    deg = weight.shape[0]
    out_f = weight.shape[2]
    cdt = compute_dtype

    n_p = _round_up(n, 128)
    out_f_p = _round_up(out_f, 128)

    if bias is None:
        bias = jnp.zeros((out_f,), dtype=jnp.float32)

    # Adjacency: reuse as-is if the caller already prepared (cast+padded) it.
    if adj.dtype == cdt and adj.shape[1] == n_p and adj.shape[2] == n_p:
        adj_p = adj
    else:
        adj_p = prepare_adj(adj, compute_dtype=cdt)

    # support = x @ W[d], hoisted out of the kernel.  f32 MXU accumulation,
    # rounded to bf16 before the adjacency matmul (matches the reference
    # bf16-round-trip contract).  Only [D, N, out_f] bytes — negligible vs adj.
    sup = jnp.einsum('nf,dfo->dno', x.astype(cdt), weight.astype(cdt),
                     preferred_element_type=jnp.float32).astype(cdt)
    sup_p = jnp.pad(sup, ((0, 0), (0, n_p - n), (0, out_f_p - out_f)))

    b_p = jnp.pad(bias.astype(jnp.float32),
                  (0, out_f_p - out_f)).reshape(1, out_f_p)

    # Tile selection: tiles must divide n_p (no adj padding beyond 128
    # alignment).  Max adj tile 512x2048 bf16 = 2 MiB, double-buffered 4 MiB;
    # + support 2x512 KiB + output 2x256 KiB  ->  ~5.5 MiB total, well under
    # the 32 MiB scoped-VMEM default on v5e/v6e/v7x (no vmem_limit override
    # needed).  tm capped so the parallel row axis has >= 2 tiles when
    # possible (both v7x TensorCores).  Default 2-deep buffering is enough at
    # these tile sizes (per-step DMA is large and contiguous along adj lanes).
    tm = _pick_tile(n_p, (512, 256, 128), want_two_tiles=True)
    tk = _pick_tile(n_p, (2048, 1024, 512, 256, 128))

    grid = (n_p // tm, deg, n_p // tk)

    out_p = pl.pallas_call(
        _cheby_gcn_kernel,
        out_shape=jax.ShapeDtypeStruct((n_p, out_f_p), jnp.float32),
        grid_spec=pltpu.PrefetchScalarGridSpec(
            num_scalar_prefetch=0,
            grid=grid,
            in_specs=[
                # support[d, k_tile] : (tk, out_f_p) bf16 (leading dim squeezed)
                pl.BlockSpec((None, tk, out_f_p), lambda i, d, k: (d, k, 0)),
                # adj[d, i_tile, k_tile] : (tm, tk) bf16; k is the innermost
                # grid axis so consecutive adj DMAs stay contiguous along the
                # lane dimension of adj[d].
                pl.BlockSpec((None, tm, tk), lambda i, d, k: (d, i, k)),
                # bias : (1, out_f_p) f32
                pl.BlockSpec((1, out_f_p), lambda i, d, k: (0, 0)),
            ],
            out_specs=pl.BlockSpec((tm, out_f_p), lambda i, d, k: (i, 0)),
        ),
        compiler_params=pltpu.CompilerParams(
            dimension_semantics=("parallel", "arbitrary", "arbitrary")),
    )(sup_p, adj_p, b_p)

    return out_p[:n, :out_f]


def init_params(key, cheby_deg, in_features, out_features):
    """xavier_uniform_ on (D, in_f, out_f) (PyTorch 3-D fan rule) + zero bias."""
    fan_in = in_features * out_features
    fan_out = cheby_deg * out_features
    bound = (6.0 / (fan_in + fan_out)) ** 0.5
    weight = jax.random.uniform(key, (cheby_deg, in_features, out_features),
                                minval=-bound, maxval=bound, dtype=jnp.float32)
    bias = jnp.zeros((out_features,), dtype=jnp.float32)
    return weight, bias


if __name__ == "__main__":
    key = jax.random.PRNGKey(0)
    k_x, k_adj, k_w = jax.random.split(key, 3)

    N, IN_F, OUT_F, MAX_DEG = 16, 32, 64, 3
    D = 1 + MAX_DEG

    x = jax.random.normal(k_x, (N, IN_F), dtype=jnp.float32)

    # Dense stack of D Chebyshev adjacency polynomials T_0..T_3.
    # TODO(synk): torch.spmm consumes sparse adj[i]; here dense (same math).
    # A block-sparse variant would prefetch per-(d, i) nonzero k-block ids via
    # PrefetchScalarGridSpec(num_scalar_prefetch=1) and skip empty adj tiles.
    a_raw = (jax.random.uniform(k_adj, (N, N)) > 0.7).astype(jnp.float32)
    a_raw = jnp.maximum(a_raw, a_raw.T) + jnp.eye(N, dtype=jnp.float32)
    a_norm = a_raw / jnp.sum(a_raw, axis=1, keepdims=True)
    t0 = jnp.eye(N, dtype=jnp.float32)
    t1 = a_norm
    t2 = 2.0 * a_norm @ t1 - t0
    t3 = 2.0 * a_norm @ t2 - t1
    adj = jnp.stack([t0, t1, t2, t3], axis=0)          # [D, N, N]

    weight, bias = init_params(k_w, D, IN_F, OUT_F)

    # Prepare (cast/pad) adj ONCE — it is static per graph — so the forward
    # pass never pays the O(D*N^2) cast/pad HBM pass.
    adj_prepped = prepare_adj(adj)

    out = cheby_graph_convolution(x, adj_prepped, weight, bias)
    jax.block_until_ready(out)

    # Reference in plain JAX with the same bf16-input / f32-accumulate contract.
    xb = x.astype(jnp.bfloat16).astype(jnp.float32)
    ab = adj.astype(jnp.bfloat16).astype(jnp.float32)
    wb = weight.astype(jnp.bfloat16).astype(jnp.float32)
    ref = jnp.zeros((N, OUT_F), jnp.float32)
    for d in range(D):
        s = jnp.dot(xb, wb[d], precision=jax.lax.Precision.HIGHEST)
        s = s.astype(jnp.bfloat16).astype(jnp.float32)
        ref = ref + jnp.dot(ab[d], s, precision=jax.lax.Precision.HIGHEST)
    ref = ref + bias[None, :]

    assert out.shape == (N, OUT_F)
    err = float(jnp.max(jnp.abs(out - ref)))
    assert jnp.allclose(out, ref, atol=1e-2, rtol=1e-2), err

    print("KERNEL_OK")
</pallas_src>

<mosaic_0001>
module attributes {stable_mosaic.version = 11 : i64} {
  func.func @_cheby_gcn_kernel(%arg0: i32, %arg1: i32, %arg2: i32, %arg3: memref<1x128x128xbf16, #tpu.memory_space<vmem>>, %arg4: memref<1x128x128xbf16, #tpu.memory_space<vmem>>, %arg5: memref<1x128xf32, #tpu.memory_space<vmem>>, %arg6: memref<128x128xf32, #tpu.memory_space<vmem>>) attributes {dimension_semantics = [#tpu.dimension_semantics<parallel>, #tpu.dimension_semantics<arbitrary>, #tpu.dimension_semantics<arbitrary>], iteration_bounds = array<i64: 1, 4, 1>, scalar_prefetch = 0 : i64, scratch_operands = 0 : i64, tpu.core_type = #tpu.core_type<tc>, window_params = [{transform_indices = @transform_0, window_bounds = array<i64: 1, 128, 128>}, {transform_indices = @transform_1, window_bounds = array<i64: 1, 128, 128>}, {pipeline_mode = #tpu.pipeline_mode<synchronous>, transform_indices = @transform_2, window_bounds = array<i64: 1, 128>}, {transform_indices = @transform_3, window_bounds = array<i64: 128, 128>}]} {
    %c0_i32 = arith.constant 0 : i32
    %0 = arith.cmpi eq, %arg1, %c0_i32 : i32
    %c0_i32_0 = arith.constant 0 : i32
    %1 = arith.cmpi eq, %arg2, %c0_i32_0 : i32
    %2 = arith.andi %0, %1 : i1
    %3 = arith.extui %2 : i1 to i32
    %c0_i32_1 = arith.constant 0 : i32
    %4 = arith.cmpi ne, %3, %c0_i32_1 : i32
    scf.if %4 {
      %cst_11 = arith.constant 0.000000e+00 : f32
      %13 = vector.broadcast %cst_11 : f32 to vector<128x128xf32>
      %c0_12 = arith.constant 0 : index
      %c0_13 = arith.constant 0 : index
      %14 = vector.load %arg5[%c0_12, %c0_13] : memref<1x128xf32, #tpu.memory_space<vmem>>, vector<1x128xf32>
      %15 = vector.broadcast %14 : vector<1x128xf32> to vector<128x128xf32>
      %16 = arith.addf %13, %15 : vector<128x128xf32>
      %c0_14 = arith.constant 0 : index
      %c0_15 = arith.constant 0 : index
      %17 = vector.load %arg6[%c0_14, %c0_15] : memref<128x128xf32, #tpu.memory_space<vmem>>, vector<128x128xf32>
      tpu.vector_store %arg6[%c0_14, %c0_15], %16 {strides = array<i32>} : memref<128x128xf32, #tpu.memory_space<vmem>>, vector<128x128xf32>,
    } else {
    }
    %c0 = arith.constant 0 : index
    %c0_2 = arith.constant 0 : index
    %5 = vector.load %arg6[%c0, %c0_2] : memref<128x128xf32, #tpu.memory_space<vmem>>, vector<128x128xf32>
    %c0_3 = arith.constant 0 : index
    %c0_4 = arith.constant 0 : index
    %c0_5 = arith.constant 0 : index
    %6 = vector.load %arg4[%c0_3, %c0_4, %c0_5] : memref<1x128x128xbf16, #tpu.memory_space<vmem>>, vector<1x128x128xbf16>
    %7 = vector.shape_cast %6 : vector<1x128x128xbf16> to vector<128x128xbf16>
    %c0_6 = arith.constant 0 : index
    %c0_7 = arith.constant 0 : index
    %c0_8 = arith.constant 0 : index
    %8 = vector.load %arg3[%c0_6, %c0_7, %c0_8] : memref<1x128x128xbf16, #tpu.memory_space<vmem>>, vector<1x128x128xbf16>
    %9 = vector.shape_cast %8 : vector<1x128x128xbf16> to vector<128x128xbf16>
    %cst = arith.constant dense<0.000000e+00> : vector<128x128xf32>
    %10 = tpu.matmul %7, %9, %cst {dimension_numbers = #tpu.dot_dimension_numbers<[1], [0], [0], [1], [0, 0, 1, 1], [], []>} : vector<128x128xbf16>, vector<128x128xbf16>, vector<128x128xf32> -> vector<128x128xf32>
    %11 = arith.addf %5, %10 : vector<128x128xf32>
    %c0_9 = arith.constant 0 : index
    %c0_10 = arith.constant 0 : index
    %12 = vector.load %arg6[%c0_9, %c0_10] : memref<128x128xf32, #tpu.memory_space<vmem>>, vector<128x128xf32>
    tpu.vector_store %arg6[%c0_9, %c0_10], %11 {strides = array<i32>} : memref<128x128xf32, #tpu.memory_space<vmem>>, vector<128x128xf32>,
    return
  }
  func.func @transform_0(%arg0: i32, %arg1: i32, %arg2: i32) -> (i32, i32, i32) {
    %c0_i32 = arith.constant 0 : i32
    %c0_i32_0 = arith.constant 0 : i32
    return %arg1, %arg2, %c0_i32 : i32, i32, i32
  }
  func.func @transform_1(%arg0: i32, %arg1: i32, %arg2: i32) -> (i32, i32, i32) {
    %c0_i32 = arith.constant 0 : i32
    return %arg1, %arg0, %arg2 : i32, i32, i32
  }
  func.func @transform_2(%arg0: i32, %arg1: i32, %arg2: i32) -> (i32, i32) {
    %c0_i32 = arith.constant 0 : i32
    %c0_i32_0 = arith.constant 0 : i32
    %c0_i32_1 = arith.constant 0 : i32
    return %c0_i32, %c0_i32_0 : i32, i32
  }
  func.func @transform_3(%arg0: i32, %arg1: i32, %arg2: i32) -> (i32, i32) {
    %c0_i32 = arith.constant 0 : i32
    %c0_i32_0 = arith.constant 0 : i32
    return %arg0, %c0_i32 : i32, i32
  }
}

</mosaic_0001>

<bundles_post_ra>
// kernel: tpu_custom_call.1
= control target key start
LH: loop header
LB: loop body
LE: loop exit
PB: predicated region body
PF: predicated region fallthrough
CT: control target
= control target key end

     0   :  { %8 = vsyncpa [#allocation3], 0  ;;  %s1266_s0 = inlined_call_operand.hbm [shape: bf16[4,128,128], index: 0, kind: input, shape index: {}]   ;;  %s1267_s1 = inlined_call_operand.hbm [shape: bf16[4,128,128], index: 1, kind: input, shape index: {}]   ;;  %s1268_s2 = inlined_call_operand.vmem [shape: f32[1,128], index: 2, kind: input, shape index: {}]   ;;  %s1269_s3 = inlined_call_operand.hbm [shape: f32[128,128], index: 3, kind: output, shape index: {}]  }
   0x1   :  { %10 = vsyncpa [#allocation3 + $0x1], 0 }
   0x2   :  { %11 = vsyncpa [#allocation6], 0 }
   0x3   :  { %13 = vsyncpa [#allocation6 + $0x1], 0 }
   0x4   :  { %14 = vsyncpa [#allocation4], 0  ;;  %s1026_s12 = smov 0   ;;  %s1028_s13 = smov 0  }
   0x5   :  { %s1030_s14 = smov 0   ;;  %s1032_s15 = smov 0  }
   0x6   :  { %s1034_s16 = smov 0   ;;  %s1036_s17 = smov 0  }
   0x7 LB: > { %s665_s18 = sadd.s32 4294967295, %s997_s17   ;;  %s35_s19 = sadd.s32 1, %s993_s16  ;;  %s997_s17 = sphi %s1036_s17, %s20_s17   ;;  %s993_s16 = sphi %s1034_s16, %s1281_s16   ;;  %s989_s15 = sphi %s1032_s15, %s1280_s15   ;;  %s985_s14 = sphi %s1030_s14, %s1279_s14   ;;  %s981_s13 = sphi %s1028_s13, %s1278_s13   ;;  %s977_s12 = sphi %s1026_s12, %s1277_s12  }
   0x8   : > { %p37_p0 = scmp.ge.s32.totalorder %s35_s19, 4  ;;  %s48_s20 = sadd.s32 1, %s985_s14 }
   0x9   : > { %p55_p1 = scmp.ne.s32.totalorder %s985_s14, %s981_s13  ;;  %p56_p2 = scmp.eq.s32.totalorder %s997_s17, 0 }
   0xa   : > { %s1283_s19 = smov (%p37_p0, %s35_s19), 0  ;;  %p61_p4 = scmp.ne.s32.totalorder %s981_s13, %s977_s12 }
   0xb   : > { %p1062_p3 = por %p56_p2, %p55_p1  ;;  %s43_s22 = ssub.s32 %s993_s16, %s1283_s19 }
   0xc   : > { %p62_p5 = scmp.eq.s32.totalorder %s665_s18, 0  ;;  %p46_p6 = scmp.eq.s32.totalorder %s43_s22, 0 }
   0xd   : > { %p781_p8 = scmp.lt.s32.totalorder %s997_s17, 4  ;;  %s1080_s25 = sand.u32 1, %s985_s14  }
   0xe   : > { %p1071_p7 = por %p62_p5, %p61_p4  ;;  %s699_s26 = sshll.u32 %s993_s16, 10 }
   0xf   : > { %s1077_s24 = scalar_select %p46_p6, %s985_s14, %s48_s20  }
  0x10   : > { %s1272_s23 = scalar_select %p1071_p7, 1, 0 }
  0x11   : > { %s668_s27 = sshll.u32 %s1080_s25, 6  ;;  %s1089_s30 = scalar_lea.hbm %s1266_s0, %s699_s26 }
  0x12   : > { %s169_s4 = scalar_lea.vmem [#allocation2], %s668_s27  ;;  %p1095_p9 = pnand %p781_p8, %p1062_p3 }
  0x13   : > { %s178_s5 = sshll.u32 %s169_s4, 4  ;;  %s166_s7 = scalar_lea.sflag [#allocation3], %s1080_s25  ;;  %s1099_s5 = int_to_ptr.vmem [resolvable:$true] %s178_s5 }
  0x14   : > { %s853_s8 = scalar_lea.hbm %s1089_s30, 1024  ;;  %p855_p11 = pneg %p1095_p9 }
  0x15   : > { %p854_p10 = scmp.ne.s32.totalorder %s1089_s30, %s853_s8  ;;  %s858_s11 = scalar_lea.hbm %s1266_s0, 4096 }
  0x16   : > { %p859_p0 = scmp.lt.u32.totalorder %s1089_s30, %s1266_s0  ;;  %p860_p1 = scmp.lt.u32.totalorder %s858_s11, %s853_s8 }
  0x17   : > { %p856_p12 = pnand %p855_p11, %p854_p10  ;;  %p862_p3 = scmp.lt.u32.totalorder %s853_s8, %s1089_s30 }
  0x18   : > { %p861_p2 = por %p860_p1, %p859_p0 }
  0x19   : > { %p857_p13 = pneg %p856_p12 }
  0x1a   : > { %p863_p4 = por %p862_p3, %p861_p2 }
  0x1c   : > { %p864_p5 = pnand %p863_p4, %p857_p13 }
  0x1e   : > { %867 = shalt.err (!%p864_p5)
}
  0x1f   : > { %s868_s21 = scalar_lea.vmem %s1099_s5, 1024  ;;  %s999_s22 = smov [#allocation2]  }
  0x20   : > { %p869_p6 = scmp.ne.s32.totalorder %s1099_s5, %s868_s21  ;;  %s873_s28 = sshll.u32 %s999_s22, 4  ;;  %s874_s28 = int_to_ptr.vmem [resolvable:$false] %s873_s28 }
  0x21   : > { %s875_s29 = scalar_lea.vmem %s874_s28, 2048  ;;  %p876_p12 = scmp.lt.s32.totalorder %s1099_s5, %s874_s28 }
  0x22   : > { %p871_p8 = pnand %p869_p6, %p855_p11  ;;  %p877_p0 = scmp.lt.s32.totalorder %s875_s29, %s868_s21 }
  0x24   : > { %p872_p10 = pneg %p871_p8  ;;  %p878_p1 = por %p877_p0, %p876_p12 }
  0x26   : > { %p879_p2 = pnand %p878_p1, %p872_p10 }
  0x28   : > { %882 = shalt.err (!%p879_p2)
}
  0x29   : > { %s1000_s4 = smov 64   ;;  %s1001_s8 = smov 4  }
  0x2a   : > { %777 = dma.hbm_to_vmem [thread:$0]  (!%p1095_p9), %s1089_s30, 1024, %s1099_s5, %s166_s7, %s1000_s4, %s1000_s4, %s1001_s8  }
  0x2b   : > { %p674_p13 = scmp.ge.s32.totalorder %s997_s17, 1  ;;  %p210_p3 = scmp.lt.s32.totalorder %s997_s17, 5 }
  0x2c   : > { %s1143_s12 = scalar_lea.hbm %s1267_s1, %s699_s26  ;;  %s192_s20 = scalar_lea.vmem [#allocation5], %s668_s27 }
  0x2d   : > { %p1134_p4 = pnand %p674_p13, %p210_p3  ;;  %s202_s21 = sshll.u32 %s192_s20, 4  ;;  %s1147_s21 = int_to_ptr.vmem [resolvable:$true] %s202_s21 }
  0x2e   : > { %s189_s30 = scalar_lea.sflag [#allocation6], %s1080_s25  ;;  %s883_s5 = scalar_lea.hbm %s1143_s12, 1024 }
  0x2f   : > { %p884_p5 = scmp.ne.s32.totalorder %s1143_s12, %s883_s5  ;;  %s888_s26 = scalar_lea.hbm %s1267_s1, 4096 }
  0x30   : > { %p889_p10 = scmp.lt.u32.totalorder %s1143_s12, %s1267_s1  ;;  %p890_p12 = scmp.lt.u32.totalorder %s888_s26, %s883_s5 }
  0x31   : > { %p886_p6 = pnand %p884_p5, %p855_p11  ;;  %p892_p1 = scmp.lt.u32.totalorder %s883_s5, %s1143_s12 }
  0x32   : > { %p891_p0 = por %p890_p12, %p889_p10 }
  0x33   : > { %p887_p8 = pneg %p886_p6 }
  0x34   : > { %p893_p2 = por %p892_p1, %p891_p0 }
  0x36   : > { %p894_p13 = pnand %p893_p2, %p887_p8 }
  0x38   : > { %897 = shalt.err (!%p894_p13)
}
  0x39   : > { %s898_s27 = scalar_lea.vmem %s1147_s21, 1024  ;;  %s1002_s10 = smov [#allocation5]  }
  0x3a   : > { %p899_p3 = scmp.ne.s32.totalorder %s1147_s21, %s898_s27  ;;  %s903_s11 = sshll.u32 %s1002_s10, 4  ;;  %s904_s11 = int_to_ptr.vmem [resolvable:$false] %s903_s11 }
  0x3b   : > { %s905_s20 = scalar_lea.vmem %s904_s11, 2048  ;;  %p906_p7 = scmp.lt.s32.totalorder %s1147_s21, %s904_s11 }
  0x3c   : > { %p901_p5 = pnand %p899_p3, %p855_p11  ;;  %p907_p10 = scmp.lt.s32.totalorder %s905_s20, %s898_s27 }
  0x3e   : > { %p902_p6 = pneg %p901_p5  ;;  %p908_p12 = por %p907_p10, %p906_p7 }
  0x40   : > { %p909_p0 = pnand %p908_p12, %p902_p6 }
  0x42   : > { %912 = shalt.err (!%p909_p0)
}
  0x43   : > { %780 = dma.hbm_to_vmem [thread:$0]  (!%p1095_p9), %s1143_s12, 1024, %s1147_s21, %s189_s30, %s1000_s4, %s1000_s4, %s1001_s8  }
  0x44   : > { %214 = sbr.rel (%p1134_p4) target bundleno = 362 (0x16a), region = 32  ;;  %s216_s5 = sand.u32 (!%p1134_p4), 1, %s981_s13  }
  0x45   : > { %s675_s7 = sshll.u32 (!%p1134_p4), %s216_s5, 6  ;;  %s217_s22 = scalar_lea.sflag (!%p1134_p4), [#allocation3], %s216_s5 }
  0x46   : > { %s1181_s26 = scalar_lea.vmem (!%p1134_p4), [#allocation2], %s675_s7  ;;  %p1275_p7 = scmp.ne.s32.totalorder (!%p1134_p4), %s1272_s23, 0 }
  0x4b   : > { %964 = dma.done.wait (%p1275_p7), %s217_s22, 1024  }
  0x4c   : > { %966 = vsyncadd (%p1275_p7), %s217_s22, 4294966272  ;;  %s226_s25 = scalar_lea.sflag [#allocation6], %s216_s5  ;;  %s1187_s6 = scalar_lea.vmem [#allocation5], %s675_s7 }
  0x4d   : > { %968 = dma.done.wait (%p1275_p7), %s226_s25, 1024  }
  0x4e   : > { %970 = vsyncadd (%p1275_p7), %s226_s25, 4294966272  ;;  %p256_p9 = scmp.eq.s32.totalorder %s989_s15, 0 }
  0x4f   : > { %v678_v0 = vld [vmem:[%s1268_s2] ss:$0 sm:$0xff] (%p256_p9) }
  0x50   : > { %261 = sbr.rel (!%p256_p9) target bundleno = 88 (0x58), region = 44  ;;  %270 = vst [vmem:[#allocation7] sm:$0xff] (%p256_p9), %v678_v0  ;;  %271 = vst [vmem:[#allocation7 + $0x8] sm:$0xff] (%p256_p9), %v678_v0 }
  0x51   : > { %272 = vst [vmem:[#allocation7 + $0x10] sm:$0xff] (%p256_p9), %v678_v0  ;;  %273 = vst [vmem:[#allocation7 + $0x18] sm:$0xff] (%p256_p9), %v678_v0 }
  0x52   : > { %274 = vst [vmem:[#allocation7 + $0x20] sm:$0xff] (%p256_p9), %v678_v0  ;;  %275 = vst [vmem:[#allocation7 + $0x28] sm:$0xff] (%p256_p9), %v678_v0 }
  0x53   : > { %276 = vst [vmem:[#allocation7 + $0x30] sm:$0xff] (%p256_p9), %v678_v0  ;;  %277 = vst [vmem:[#allocation7 + $0x38] sm:$0xff] (%p256_p9), %v678_v0 }
  0x54   : > { %278 = vst [vmem:[#allocation7 + $0x40] sm:$0xff] (%p256_p9), %v678_v0  ;;  %279 = vst [vmem:[#allocation7 + $0x48] sm:$0xff] (%p256_p9), %v678_v0 }
  0x55   : > { %280 = vst [vmem:[#allocation7 + $0x50] sm:$0xff] (%p256_p9), %v678_v0  ;;  %281 = vst [vmem:[#allocation7 + $0x58] sm:$0xff] (%p256_p9), %v678_v0 }
  0x56   : > { %282 = vst [vmem:[#allocation7 + $0x60] sm:$0xff] (%p256_p9), %v678_v0  ;;  %283 = vst [vmem:[#allocation7 + $0x68] sm:$0xff] (%p256_p9), %v678_v0 }
  0x57   : > { %284 = vst [vmem:[#allocation7 + $0x70] sm:$0xff] %v678_v0  ;;  %285 = vst [vmem:[#allocation7 + $0x78] sm:$0xff] %v678_v0 }
  0x58 PF: > { %v837_v1 = vld [vmem:[%s1181_s26] sm:$0xff]   ;;  %v838_v2 = vld [vmem:[%s1181_s26 + $0x8] sm:$0xff]   ;;  %v839_v3 = vld [vmem:[%s1181_s26 + $0x10] sm:$0xff]   ;;  %s1003_s15 = smov [#allocation7]   ;;  %p1215_p11 = scmp.eq.s32.totalorder %s665_s18, 3 }
  0x59   : > { %718 = vmatprep.subr.bf16.mxu0 %v837_v1  ;;  %750 = vmatprep.subr.bf16.mxu1 %v837_v1  ;;  %v840_v4 = vld [vmem:[%s1181_s26 + $0x18] sm:$0xff]   ;;  %v845_v5 = vld [vmem:[%s1187_s6] sm:$0xff]   ;;  %v842_v8 = vld [vmem:[%s1181_s26 + $0x28] sm:$0xff]   ;;  %s568_s23 = sshll.u32 %s1003_s15, 4  ;;  %s1219_s23 = int_to_ptr.vmem [resolvable:$true] %s568_s23 }
  0x5a   : > { %719 = vmatpush3.bf16.msra.mxu0 %v837_v1  ;;  %758 = vmatpush3.bf16.msra.mxu1 %v837_v1  ;;  %v846_v6 = vld [vmem:[%s1187_s6 + $0x20] sm:$0xff]   ;;  %v843_v9 = vld [vmem:[%s1181_s26 + $0x30] sm:$0xff]   ;;  %v844_v10 = vld [vmem:[%s1181_s26 + $0x38] sm:$0xff]   ;;  %s913_s12 = scalar_lea.vmem %s1219_s23, 2048  ;;  %p920_p2 = scmp.lt.s32.totalorder %s1219_s23, %s1219_s23 }
  0x5b   : > { %720 = vmatprep.subr.bf16.mxu0 %v838_v2  ;;  %751 = vmatprep.subr.bf16.mxu1 %v838_v2  ;;  %v841_v7 = vld [vmem:[%s1181_s26 + $0x20] sm:$0xff]   ;;  %v847_v11 = vld [vmem:[%s1187_s6 + $0x8] sm:$0xff]   ;;  %v849_v13 = vld [vmem:[%s1187_s6 + $0x10] sm:$0xff]   ;;  %p914_p4 = scmp.ne.s32.totalorder %s1219_s23, %s913_s12  ;;  %p921_p13 = scmp.lt.s32.totalorder %s913_s12, %s913_s12 }
  0x5c   : > { %734 = vmatprep.mubr.bf16.mxu0 %v845_v5  ;;  %742 = vmatprep.mubr.bf16.mxu1 %v846_v6  ;;  %v848_v12 = vld [vmem:[%s1187_s6 + $0x28] sm:$0xff]   ;;  %v850_v14 = vld [vmem:[%s1187_s6 + $0x30] sm:$0xff]   ;;  %v851_v15 = vld [vmem:[%s1187_s6 + $0x18] sm:$0xff]  }
  0x5d   : > { %v852_v16 = vld [vmem:[%s1187_s6 + $0x38] sm:$0xff]   ;;  %v288_v17 = vld [vmem:[#allocation7 + $0x10] sm:$0xff]  ;;  %v286_v19 = vld [vmem:[#allocation7] sm:$0xff]  ;;  %p915_p8 = pnand %p914_p4, %p1215_p11  ;;  %p922_p3 = por %p921_p13, %p920_p2 }
  0x5e   : > { %721 = vmatpush3.bf16.msra.mxu0 %v838_v2  ;;  %759 = vmatpush3.bf16.msra.mxu1 %v838_v2  ;;  %v296_v18 = vld [vmem:[#allocation7 + $0x50] sm:$0xff]  ;;  %v294_v20 = vld [vmem:[#allocation7 + $0x40] sm:$0xff]  ;;  %v289_v23 = vld [vmem:[#allocation7 + $0x18] sm:$0xff] }
  0x5f   : > { %722 = vmatprep.subr.bf16.mxu0 %v839_v3  ;;  %752 = vmatprep.subr.bf16.mxu1 %v839_v3  ;;  %v297_v24 = vld [vmem:[#allocation7 + $0x58] sm:$0xff]  ;;  %v287_v29 = vld [vmem:[#allocation7 + $0x8] sm:$0xff]  ;;  %v292_v41 = vld [vmem:[#allocation7 + $0x30] sm:$0xff]  ;;  %p916_p1 = pneg %p915_p8 }
  0x60   : > { %v295_v30 = vld [vmem:[#allocation7 + $0x48] sm:$0xff]  ;;  %v300_v42 = vld [vmem:[#allocation7 + $0x70] sm:$0xff]  ;;  %v290_v43 = vld [vmem:[#allocation7 + $0x20] sm:$0xff] }
  0x61   : > { %v298_v44 = vld [vmem:[#allocation7 + $0x60] sm:$0xff]  ;;  %v293_v47 = vld [vmem:[#allocation7 + $0x38] sm:$0xff]  ;;  %v291_v53 = vld [vmem:[#allocation7 + $0x28] sm:$0xff]  ;;  %p923_p5 = pnand %p922_p3, %p916_p1 }
  0x62   : > { %723 = vmatpush3.bf16.msra.mxu0 %v839_v3  ;;  %760 = vmatpush3.bf16.msra.mxu1 %v839_v3  ;;  %v301_v48 = vld [vmem:[#allocation7 + $0x78] sm:$0xff]  ;;  %v299_v54 = vld [vmem:[#allocation7 + $0x68] sm:$0xff] }
  0x63   : > { %724 = vmatprep.subr.bf16.mxu0 %v840_v4  ;;  %753 = vmatprep.subr.bf16.mxu1 %v840_v4 }
  0x66   : > { %725 = vmatpush3.bf16.msra.mxu0 %v840_v4  ;;  %761 = vmatpush3.bf16.msra.mxu1 %v840_v4 }
  0x67   : > { %726 = vmatprep.subr.bf16.mxu0 %v841_v7  ;;  %754 = vmatprep.subr.bf16.mxu1 %v841_v7 }
  0x6a   : > { %727 = vmatpush3.bf16.msra.mxu0 %v841_v7  ;;  %762 = vmatpush3.bf16.msra.mxu1 %v841_v7 }
  0x6b   : > { %728 = vmatprep.subr.bf16.mxu0 %v842_v8  ;;  %755 = vmatprep.subr.bf16.mxu1 %v842_v8 }
  0x6e   : > { %729 = vmatpush3.bf16.msra.mxu0 %v842_v8  ;;  %763 = vmatpush3.bf16.msra.mxu1 %v842_v8 }
  0x6f   : > { %730 = vmatprep.subr.bf16.mxu0 %v843_v9  ;;  %756 = vmatprep.subr.bf16.mxu1 %v843_v9 }
  0x72   : > { %731 = vmatpush3.bf16.msra.mxu0 %v843_v9  ;;  %764 = vmatpush3.bf16.msra.mxu1 %v843_v9 }
  0x73   : > { %732 = vmatprep.subr.bf16.mxu0 %v844_v10  ;;  %757 = vmatprep.subr.bf16.mxu1 %v844_v10 }
  0x76   : > { %733 = vmatpush3.bf16.msra.mxu0 %v844_v10  ;;  %765 = vmatpush3.bf16.msra.mxu1 %v844_v10 }
  0x79   : > { %735 = vmatmul.mubr.bf16.vlgmr.msra.gmra.mrb[0].mxu0 %v847_v11  ;;  %743 = vmatmul.mubr.bf16.vlgmr.msra.gmra.mrb[0].mxu1 %v848_v12 }
  0x7a   : > { %738 = vmatprep.mubr.bf16.mxu0 %v849_v13  ;;  %746 = vmatprep.mubr.bf16.mxu1 %v850_v14 }
  0x81   : > { %739 = vmatmul.mubr.bf16.gmra.mrb[4].mxu0 %v851_v15  ;;  %747 = vmatmul.mubr.bf16.gmra.mrb[4].mxu1 %v852_v16 }
 0x14c   : > { %v736_v21 = vpop.f32.mrb[0].mxu0  ;;  %v744_v22 = vpop.f32.mrb[0].mxu1 }
 0x14d   : > { %v529_v25 = vadd.f32 %v736_v21, %v288_v17  ;;  %v537_v26 = vadd.f32 %v744_v22, %v296_v18  ;;  %v464_v27 = vpop.f32.mrb[1].mxu0  ;;  %v496_v28 = vpop.f32.mrb[1].mxu1 }
 0x14e   : > { %v527_v31 = vadd.f32 %v464_v27, %v286_v19  ;;  %v535_v32 = vadd.f32 %v496_v28, %v294_v20  ;;  %v737_v33 = vpop.f32.mrb[2].mxu0  ;;  %v745_v34 = vpop.f32.mrb[2].mxu1 }
 0x14f   : > { %545 = vst [vmem:[#allocation7 + $0x10] sm:$0xff] %v529_v25  ;;  %553 = vst [vmem:[#allocation7 + $0x50] sm:$0xff] %v537_v26  ;;  %v530_v35 = vadd.f32 %v737_v33, %v289_v23  ;;  %v538_v36 = vadd.f32 %v745_v34, %v297_v24  ;;  %v467_v37 = vpop.f32.mrb[3].mxu0  ;;  %v499_v38 = vpop.f32.mrb[3].mxu1 }
 0x150   : > { %543 = vst [vmem:[#allocation7] sm:$0xff] %v527_v31  ;;  %551 = vst [vmem:[#allocation7 + $0x40] sm:$0xff] %v535_v32  ;;  %v528_v39 = vadd.f32 %v467_v37, %v287_v29  ;;  %v536_v40 = vadd.f32 %v499_v38, %v295_v30 }
 0x151   : > { %546 = vst [vmem:[#allocation7 + $0x18] sm:$0xff] %v530_v35  ;;  %554 = vst [vmem:[#allocation7 + $0x58] sm:$0xff] %v538_v36 }
 0x152   : > { %544 = vst [vmem:[#allocation7 + $0x8] sm:$0xff] %v528_v39  ;;  %552 = vst [vmem:[#allocation7 + $0x48] sm:$0xff] %v536_v40 }
 0x154   : > { %v740_v45 = vpop.f32.mrb[4].mxu0  ;;  %v748_v46 = vpop.f32.mrb[4].mxu1 }
 0x155   : > { %v533_v49 = vadd.f32 %v740_v45, %v292_v41  ;;  %v541_v50 = vadd.f32 %v748_v46, %v300_v42  ;;  %v480_v51 = vpop.f32.mrb[5].mxu0  ;;  %v512_v52 = vpop.f32.mrb[5].mxu1 }
 0x156   : > { %v531_v55 = vadd.f32 %v480_v51, %v290_v43  ;;  %v539_v56 = vadd.f32 %v512_v52, %v298_v44  ;;  %v741_v57 = vpop.f32.mrb[6].mxu0  ;;  %v749_v58 = vpop.f32.mrb[6].mxu1 }
 0x157   : > { %549 = vst [vmem:[#allocation7 + $0x30] sm:$0xff] %v533_v49  ;;  %557 = vst [vmem:[#allocation7 + $0x70] sm:$0xff] %v541_v50  ;;  %v534_v59 = vadd.f32 %v741_v57, %v293_v47  ;;  %v542_v60 = vadd.f32 %v749_v58, %v301_v48  ;;  %v483_v61 = vpop.f32.mrb[7].mxu0  ;;  %v515_v62 = vpop.f32.mrb[7].mxu1 }
 0x158   : > { %547 = vst [vmem:[#allocation7 + $0x20] sm:$0xff] %v531_v55  ;;  %555 = vst [vmem:[#allocation7 + $0x60] sm:$0xff] %v539_v56  ;;  %v532_v63 = vadd.f32 %v483_v61, %v291_v53  ;;  %v540_v0 = vadd.f32 %v515_v62, %v299_v54 }
 0x159   : > { %550 = vst [vmem:[#allocation7 + $0x38] sm:$0xff] %v534_v59  ;;  %558 = vst [vmem:[#allocation7 + $0x78] sm:$0xff] %v542_v60 }
 0x15a   : > { %548 = vst [vmem:[#allocation7 + $0x28] sm:$0xff] %v532_v63  ;;  %556 = vst [vmem:[#allocation7 + $0x68] sm:$0xff] %v540_v0 }
 0x15b   : > { %926 = shalt.err (!%p923_p5)
}
 0x15c   : > { %s927_s30 = scalar_lea.hbm %s1269_s3, 2048 }
 0x15d   : > { %p928_p6 = scmp.ne.s32.totalorder %s1269_s3, %s927_s30  ;;  %p933_p0 = scmp.lt.u32.totalorder %s927_s30, %s1269_s3 }
 0x15f   : > { %p929_p10 = pnand %p928_p6, %p1215_p11 }
 0x161   : > { %p930_p12 = pneg %p929_p10 }
 0x163   : > { %p935_p7 = pnand %p933_p0, %p930_p12 }
 0x165   : > { %938 = shalt.err (!%p935_p7)
}
 0x166   : > { %s1004_s11 = smov 128   ;;  %s1005_s20 = smov 8  }
 0x167   : > { %771 = dma.vmem_to_hbm [thread:$0]  (%p1215_p11), %s1219_s23, 2048, %s1269_s3, [#allocation4], %s1004_s11, %s1004_s11, %s1005_s20  }
 0x168   : > { %972 = dma.done.wait (%p1215_p11), [#allocation4], 2048  }
 0x169   : > { %974 = vsyncadd (%p1215_p11), [#allocation4], 4294965248 }
 0x16a PF: > { %s20_s17 = sadd.s32 1, %s997_s17   ;;  %s1277_s12 = smov %s981_s13 }
 0x16b   : > { %p17_p9 = scmp.ge.s32.totalorder %s20_s17, 6   ;;  %s1278_s13 = smov %s985_s14 }
 0x16c   : > { %s1279_s14 = smov %s1077_s24  ;;  %s1280_s15 = smov %s993_s16 }
 0x16d   : > { %s1281_s16 = smov %s1283_s19  ;;  %19 = sbr.rel (!%p17_p9) target bundleno = 7 (0x7), region = 87 }
 0x174   :  { %584 = vsyncpa [#allocation3], 1 }
 0x175   :  { %586 = vsyncpa [#allocation3 + $0x1], 1 }
 0x176   :  { %587 = vsyncpa [#allocation6], 1 }
 0x177   :  { %589 = vsyncpa [#allocation6 + $0x1], 1 }
 0x178   :  { %590 = vsyncpa [#allocation4], 1 }
 0x179   :  { %592 = vsyncpa [#allocation4 + $0x1], 1 }

</bundles_post_ra>
